<compile_context>
chip_gen: v6e
topology: v6e:2x2x1
jax: 0.10.0
libtpu: 0.0.40
codegen_flags: <defaults>
</compile_context>

<pallas_src>
import math

import jax
import jax.numpy as jnp
from jax.experimental import pallas as pl
from jax.experimental.pallas import tpu as pltpu

_MASK_VALUE = -1e30  # Python float: "minus infinity" for padded class columns
_VMEM_BUDGET_BYTES = 44 * (1 << 20)  # v7x-safe target (64 MiB physical)


def _round_up(a, b):
    return ((a + b - 1) // b) * b


def _make_output_linear_kernel(num_valid_classes, tn, has_bias, needs_mask, use_acc):
    """Specialize on static config: bias presence, class padding, K-tiling."""

    def kernel(*refs):
        idx = 0
        x_ref = refs[idx]; idx += 1
        w_ref = refs[idx]; idx += 1
        b_ref = None
        if has_bias:
            b_ref = refs[idx]; idx += 1
        o_ref = refs[idx]; idx += 1
        acc = None
        if use_acc:
            acc = refs[idx]; idx += 1
        m_sc = refs[idx]; idx += 1
        l_sc = refs[idx]

        j = pl.program_id(1)            # class-tile index
        nj = pl.num_programs(1)
        if use_acc:
            k = pl.program_id(2)        # feature-tile index (innermost)
            nk = pl.num_programs(2)
            first_step = jnp.logical_and(j == 0, k == 0)
        else:
            first_step = j == 0

        @pl.when(first_step)
        def _init_stats():
            m_sc[...] = jnp.full_like(m_sc, -jnp.inf)
            l_sc[...] = jnp.zeros_like(l_sc)

        # MXU: contract shared feature (last) axis of x [tm, tk] and w [tn, tk]
        # directly -> [tm, tn]; f32 accumulation, no weight-tile transpose.
        part = jax.lax.dot_general(
            x_ref[...], w_ref[...],
            dimension_numbers=(((1,), (1,)), ((), ())),
            preferred_element_type=jnp.float32,
        )

        if use_acc:
            @pl.when(k == 0)
            def _zero_acc():
                acc[...] = jnp.zeros_like(acc)
            acc[...] += part

        def _class_tile_epilogue():
            logits = acc[...] if use_acc else part
            if has_bias:
                bias_tile = b_ref[:, pl.ds(pl.multiple_of(j * tn, 128), tn)]
                logits = logits + bias_tile.astype(jnp.float32)
            if needs_mask:
                # Only the last class tile can contain padded columns; mask them
                # so they contribute nothing to max / sum-exp.
                col = jax.lax.broadcasted_iota(jnp.int32, logits.shape, 1) + j * tn
                logits = jnp.where(col < num_valid_classes, logits, _MASK_VALUE)

            # Online log-sum-exp statistics across class tiles (f32 on VPU/EUP).
            m_prev = m_sc[...]
            m_new = jnp.maximum(m_prev, jnp.max(logits, axis=-1, keepdims=True))
            l_sc[...] = (l_sc[...] * jnp.exp(m_prev - m_new)
                         + jnp.sum(jnp.exp(logits - m_new), axis=-1, keepdims=True))
            m_sc[...] = m_new

            # Write raw logits straight into the resident output block at a
            # 128-aligned lane offset (no separate logits scratch).
            o_ref[:, pl.ds(pl.multiple_of(j * tn, 128), tn)] = logits

        def _finalize():
            lse = m_sc[...] + jnp.log(l_sc[...])
            o_ref[...] = o_ref[...] - lse   # single vectorized RMW on the block

        if use_acc:
            @pl.when(k == nk - 1)
            def _():
                _class_tile_epilogue()

            @pl.when(jnp.logical_and(j == nj - 1, k == nk - 1))
            def _():
                _finalize()
        else:
            _class_tile_epilogue()

            @pl.when(j == nj - 1)
            def _():
                _finalize()

    return kernel


def _vmem_footprint_bytes(tm, tn, tk, Cp, in_itemsize, has_bias, use_acc):
    fp = 2 * tm * tk * in_itemsize        # x tile (double-buffered)
    fp += 2 * tn * tk * in_itemsize       # weight tile (double-buffered)
    fp += 2 * tm * Cp * 4                 # resident output block (double-buffered)
    if has_bias:
        fp += 2 * 8 * Cp * 4              # bias block (sublane-padded)
    if use_acc:
        fp += tm * tn * 4                 # K accumulator
    fp += 2 * tm * 128 * 4                # m/l scratch (lane-padded)
    return fp


def output_linear_forward(x, weight, bias=None, *,
                          tm=None, tn=None, tk=None,
                          compute_dtype=jnp.bfloat16,
                          vmem_limit_bytes=None,
                          interpret=False):
    """log_softmax(x @ weight.T + bias, axis=1).

    x: [B, F], weight: [C, F] (PyTorch nn.Linear layout), bias: [C] or None.
    compute_dtype: dtype for the MXU operands (default bfloat16 -- the kernel is
    HBM-bound on weight streaming, so narrower operands ~halve wall-clock).
    Accumulation and the log-softmax epilogue are always float32.
    """
    B, F = x.shape
    C, F2 = weight.shape
    assert F2 == F, "weight in_features mismatch"

    if compute_dtype is not None:
        x = x.astype(compute_dtype)
        weight = weight.astype(compute_dtype)
    in_itemsize = jnp.dtype(x.dtype).itemsize

    # Class tile: lane-dense (multiple of 128).
    if tn is None:
        tn = min(256, _round_up(C, 128))
    tn = _round_up(max(tn, 128), 128)
    Cp = _round_up(C, tn)                # tn | Cp; last tile keeps >=1 valid column
    n_ctiles = Cp // tn

    # Feature (K) tile: full F when small, otherwise 128-aligned chunks.
    if tk is None:
        tk = F if F <= 1024 else 512
    if tk >= F:
        tk = F
    else:
        tk = _round_up(max(tk, 128), 128)
    Fp = _round_up(F, tk)
    n_ktiles = Fp // tk
    use_acc = n_ktiles > 1

    # Batch tile: big by default to amortize weight streaming; budget-guarded.
    if tm is None:
        tm = min(256, _round_up(B, 8))
    tm = _round_up(max(tm, 8), 8)
    while (_vmem_footprint_bytes(tm, tn, tk, Cp, in_itemsize,
                                 bias is not None, use_acc) > _VMEM_BUDGET_BYTES
           and tm > 8):
        tm = _round_up(max(8, tm // 2), 8)
    # TODO(synk): for very large num_classes where even tm=8 exceeds the VMEM
    # budget (v7x, 64 MiB), switch to a two-pass scheme (unnormalized logits +
    # per-row lse output, normalized in a cheap second pass).
    Bp = _round_up(B, tm)

    footprint = _vmem_footprint_bytes(tm, tn, tk, Cp, in_itemsize,
                                      bias is not None, use_acc)
    if vmem_limit_bytes is None:
        vmem_limit_bytes = int(min(max(int(footprint * 1.3), 32 * (1 << 20)),
                                   100 * (1 << 20)))

    # Pad operands outside the kernel. Padded class columns are masked in-kernel;
    # padded batch rows / feature columns are zeros (zeros contribute 0 to dot).
    pad_b, pad_c, pad_f = Bp - B, Cp - C, Fp - F
    xp = jnp.pad(x, ((0, pad_b), (0, pad_f))) if (pad_b or pad_f) else x
    wp = jnp.pad(weight, ((0, pad_c), (0, pad_f))) if (pad_c or pad_f) else weight

    has_bias = bias is not None
    needs_mask = Cp != C

    if use_acc:
        grid = (Bp // tm, n_ctiles, n_ktiles)
        x_spec = pl.BlockSpec((tm, tk), lambda i, j, k: (i, k))
        w_spec = pl.BlockSpec((tn, tk), lambda i, j, k: (j, k))
        b_spec = pl.BlockSpec((1, Cp), lambda i, j, k: (0, 0))   # resident bias
        o_spec = pl.BlockSpec((tm, Cp), lambda i, j, k: (i, 0))  # resident output
        dim_sem = ("parallel", "arbitrary", "arbitrary")
    else:
        grid = (Bp // tm, n_ctiles)
        x_spec = pl.BlockSpec((tm, tk), lambda i, j: (i, 0))
        w_spec = pl.BlockSpec((tn, tk), lambda i, j: (j, 0))
        b_spec = pl.BlockSpec((1, Cp), lambda i, j: (0, 0))
        o_spec = pl.BlockSpec((tm, Cp), lambda i, j: (i, 0))
        dim_sem = ("parallel", "arbitrary")

    in_specs = [x_spec, w_spec]
    operands = [xp, wp]
    if has_bias:
        bp = jnp.pad(bias.astype(jnp.float32), (0, Cp - C)).reshape(1, Cp)
        in_specs.append(b_spec)
        operands.append(bp)

    scratch_shapes = []
    if use_acc:
        scratch_shapes.append(pltpu.VMEM((tm, tn), jnp.float32))  # K accumulator
    scratch_shapes += [
        pltpu.VMEM((tm, 1), jnp.float32),   # running row max
        pltpu.VMEM((tm, 1), jnp.float32),   # running row sum-exp
    ]

    kernel = _make_output_linear_kernel(C, tn, has_bias, needs_mask, use_acc)

    cost = pl.CostEstimate(
        flops=2 * Bp * Cp * Fp,
        transcendentals=Bp * Cp,
        bytes_accessed=int(xp.size * in_itemsize
                           + (Bp // tm) * wp.size * in_itemsize
                           + Bp * Cp * 4),
    )

    out = pl.pallas_call(
        kernel,
        out_shape=jax.ShapeDtypeStruct((Bp, Cp), jnp.float32),
        grid_spec=pltpu.PrefetchScalarGridSpec(
            num_scalar_prefetch=0,
            grid=grid,
            in_specs=in_specs,
            out_specs=o_spec,
            scratch_shapes=scratch_shapes,
        ),
        compiler_params=pltpu.CompilerParams(
            dimension_semantics=dim_sem,
            vmem_limit_bytes=vmem_limit_bytes,
        ),
        cost_estimate=cost,
        interpret=interpret,
    )(*operands)

    return out[:B, :C]


def _reference(x, weight, bias):
    logits = x @ weight.T
    if bias is not None:
        logits = logits + bias
    return jax.nn.log_softmax(logits, axis=1)


if __name__ == "__main__":
    key = jax.random.PRNGKey(0)

    # Case 1: the module's small shape (batch=8, in_features=32, num_classes=16,
    # bias=True), f32 operands for a tight-tolerance check.
    batch, in_features, num_classes = 8, 32, 16
    kx, kw, kb, key = jax.random.split(key, 4)
    bound = 1.0 / math.sqrt(in_features)
    weight = jax.random.uniform(kw, (num_classes, in_features), jnp.float32, -bound, bound)
    bias = jax.random.uniform(kb, (num_classes,), jnp.float32, -bound, bound)
    x = jax.random.normal(kx, (batch, in_features), jnp.float32)

    out = jax.block_until_ready(
        output_linear_forward(x, weight, bias, compute_dtype=jnp.float32))
    ref = _reference(x, weight, bias)
    assert out.shape == (batch, num_classes)
    assert jnp.allclose(out, ref, atol=1e-5, rtol=1e-5), "case 1 mismatch vs reference"

    # Case 2: multi-tile grid (3 batch x 2 class tiles), online LSE across class
    # tiles, class padding 200->256, no bias, default bf16 operand path.
    batch2, in_features2, num_classes2 = 24, 32, 200
    kx2, kw2, key = jax.random.split(key, 3)
    weight2 = 0.1 * jax.random.normal(kw2, (num_classes2, in_features2), jnp.float32)
    x2 = jax.random.normal(kx2, (batch2, in_features2), jnp.float32)

    out2 = jax.block_until_ready(output_linear_forward(x2, weight2, None, tm=8, tn=128))
    ref2 = _reference(x2, weight2, None)
    assert out2.shape == (batch2, num_classes2)
    assert jnp.allclose(out2, ref2, atol=3e-2, rtol=1e-2), "case 2 mismatch vs reference"

    # Case 3: feature (K) tiling path with the (tm, tn) accumulator, bias=True,
    # class padding 96->128, f32 operands for a tight-tolerance check.
    batch3, in_features3, num_classes3 = 16, 256, 96
    kx3, kw3, kb3 = jax.random.split(key, 3)
    weight3 = 0.05 * jax.random.normal(kw3, (num_classes3, in_features3), jnp.float32)
    bias3 = 0.1 * jax.random.normal(kb3, (num_classes3,), jnp.float32)
    x3 = jax.random.normal(kx3, (batch3, in_features3), jnp.float32)

    out3 = jax.block_until_ready(
        output_linear_forward(x3, weight3, bias3, tm=8, tn=128, tk=128,
                              compute_dtype=jnp.float32))
    ref3 = _reference(x3, weight3, bias3)
    assert out3.shape == (batch3, num_classes3)
    assert jnp.allclose(out3, ref3, atol=1e-5, rtol=1e-5), "case 3 mismatch vs reference"

    print("KERNEL_OK")
</pallas_src>

<mosaic_0001>
module attributes {stable_mosaic.version = 11 : i64} {
  func.func @kernel(%arg0: i32, %arg1: i32, %arg2: memref<8x32xf32, #tpu.memory_space<vmem>>, %arg3: memref<128x32xf32, #tpu.memory_space<vmem>>, %arg4: memref<1x128xf32, #tpu.memory_space<vmem>>, %arg5: memref<8x128xf32, #tpu.memory_space<vmem>>, %arg6: memref<8x1xf32, #tpu.memory_space<vmem>>, %arg7: memref<8x1xf32, #tpu.memory_space<vmem>>) attributes {dimension_semantics = [#tpu.dimension_semantics<parallel>, #tpu.dimension_semantics<arbitrary>], iteration_bounds = array<i64: 1, 1>, scalar_prefetch = 0 : i64, scratch_operands = 2 : i64, tpu.core_type = #tpu.core_type<tc>, window_params = [{transform_indices = @transform_0, window_bounds = array<i64: 8, 32>}, {transform_indices = @transform_1, window_bounds = array<i64: 128, 32>}, {pipeline_mode = #tpu.pipeline_mode<synchronous>, transform_indices = @transform_2, window_bounds = array<i64: 1, 128>}, {transform_indices = @transform_3, window_bounds = array<i64: 8, 128>}]} {
    %c0_i32 = arith.constant 0 : i32
    %0 = arith.cmpi eq, %arg1, %c0_i32 : i32
    %1 = arith.extui %0 : i1 to i32
    %c0_i32_0 = arith.constant 0 : i32
    %2 = arith.cmpi ne, %1, %c0_i32_0 : i32
    scf.if %2 {
      %cst_21 = arith.constant 0xFF800000 : f32
      %43 = vector.broadcast %cst_21 : f32 to vector<8x1xf32>
      %c0_22 = arith.constant 0 : index
      %c0_23 = arith.constant 0 : index
      %44 = vector.load %arg6[%c0_22, %c0_23] : memref<8x1xf32, #tpu.memory_space<vmem>>, vector<8x1xf32>
      tpu.vector_store %arg6[%c0_22, %c0_23], %43 {strides = array<i32>} : memref<8x1xf32, #tpu.memory_space<vmem>>, vector<8x1xf32>,
      %cst_24 = arith.constant 0.000000e+00 : f32
      %45 = vector.broadcast %cst_24 : f32 to vector<8x1xf32>
      %c0_25 = arith.constant 0 : index
      %c0_26 = arith.constant 0 : index
      %46 = vector.load %arg7[%c0_25, %c0_26] : memref<8x1xf32, #tpu.memory_space<vmem>>, vector<8x1xf32>
      tpu.vector_store %arg7[%c0_25, %c0_26], %45 {strides = array<i32>} : memref<8x1xf32, #tpu.memory_space<vmem>>, vector<8x1xf32>,
    } else {
    }
    %c0 = arith.constant 0 : index
    %c0_1 = arith.constant 0 : index
    %3 = vector.load %arg2[%c0, %c0_1] : memref<8x32xf32, #tpu.memory_space<vmem>>, vector<8x32xf32>
    %c0_2 = arith.constant 0 : index
    %c0_3 = arith.constant 0 : index
    %4 = vector.load %arg3[%c0_2, %c0_3] : memref<128x32xf32, #tpu.memory_space<vmem>>, vector<128x32xf32>
    %cst = arith.constant dense<0.000000e+00> : vector<8x128xf32>
    %5 = tpu.matmul %3, %4, %cst {dimension_numbers = #tpu.dot_dimension_numbers<[1], [1], [0], [0], [0, 0, 1, 0], [], []>} : vector<8x32xf32>, vector<128x32xf32>, vector<8x128xf32> -> vector<8x128xf32>
    %c128_i32 = arith.constant 128 : i32
    %6 = arith.muli %arg1, %c128_i32 : i32
    %7 = tpu.assume_multiple %6, 128 : i32
    %c0_4 = arith.constant 0 : index
    %8 = arith.index_cast %7 : i32 to index
    %9 = vector.load %arg4[%c0_4, %8] : memref<1x128xf32, #tpu.memory_space<vmem>>, vector<1x128xf32>
    %10 = vector.broadcast %9 : vector<1x128xf32> to vector<8x128xf32>
    %11 = arith.addf %5, %10 : vector<8x128xf32>
    %12 = tpu.iota {dimensions = array<i32: 1>} : vector<8x128xi32>
    %c128_i32_5 = arith.constant 128 : i32
    %13 = arith.muli %arg1, %c128_i32_5 : i32
    %14 = vector.broadcast %13 : i32 to vector<8x128xi32>
    %15 = arith.addi %12, %14 : vector<8x128xi32>
    %c16_i32 = arith.constant 16 : i32
    %16 = vector.broadcast %c16_i32 : i32 to vector<8x128xi32>
    %17 = arith.cmpi slt, %15, %16 : vector<8x128xi32>
    %cst_6 = arith.constant -1.000000e+30 : f32
    %18 = vector.broadcast %cst_6 : f32 to vector<8x128xf32>
    %19 = arith.select %17, %11, %18 : vector<8x128xi1>, vector<8x128xf32>
    %c0_7 = arith.constant 0 : index
    %c0_8 = arith.constant 0 : index
    %20 = vector.load %arg6[%c0_7, %c0_8] : memref<8x1xf32, #tpu.memory_space<vmem>>, vector<8x1xf32>
    %cst_9 = arith.constant dense<0xFF800000> : vector<8xf32>
    %21 = vector.multi_reduction <maximumf>, %19, %cst_9 [1] : vector<8x128xf32> to vector<8xf32>
    %22 = vector.shape_cast %21 : vector<8xf32> to vector<8x1xf32>
    %23 = arith.maximumf %20, %22 : vector<8x1xf32>
    %c0_10 = arith.constant 0 : index
    %c0_11 = arith.constant 0 : index
    %24 = vector.load %arg7[%c0_10, %c0_11] : memref<8x1xf32, #tpu.memory_space<vmem>>, vector<8x1xf32>
    %25 = arith.subf %20, %23 : vector<8x1xf32>
    %26 = math.exp %25 : vector<8x1xf32>
    %27 = arith.mulf %24, %26 : vector<8x1xf32>
    %28 = vector.broadcast %23 : vector<8x1xf32> to vector<8x128xf32>
    %29 = arith.subf %19, %28 : vector<8x128xf32>
    %30 = math.exp %29 : vector<8x128xf32>
    %cst_12 = arith.constant dense<0.000000e+00> : vector<8xf32>
    %31 = vector.multi_reduction <add>, %30, %cst_12 [1] : vector<8x128xf32> to vector<8xf32>
    %32 = vector.shape_cast %31 : vector<8xf32> to vector<8x1xf32>
    %33 = arith.addf %27, %32 : vector<8x1xf32>
    %c0_13 = arith.constant 0 : index
    %c0_14 = arith.constant 0 : index
    %34 = vector.load %arg7[%c0_13, %c0_14] : memref<8x1xf32, #tpu.memory_space<vmem>>, vector<8x1xf32>
    tpu.vector_store %arg7[%c0_13, %c0_14], %33 {strides = array<i32>} : memref<8x1xf32, #tpu.memory_space<vmem>>, vector<8x1xf32>,
    %c0_15 = arith.constant 0 : index
    %c0_16 = arith.constant 0 : index
    %35 = vector.load %arg6[%c0_15, %c0_16] : memref<8x1xf32, #tpu.memory_space<vmem>>, vector<8x1xf32>
    tpu.vector_store %arg6[%c0_15, %c0_16], %23 {strides = array<i32>} : memref<8x1xf32, #tpu.memory_space<vmem>>, vector<8x1xf32>,
    %c128_i32_17 = arith.constant 128 : i32
    %36 = arith.muli %arg1, %c128_i32_17 : i32
    %37 = tpu.assume_multiple %36, 128 : i32
    %c0_18 = arith.constant 0 : index
    %38 = arith.index_cast %37 : i32 to index
    %39 = vector.load %arg5[%c0_18, %38] : memref<8x128xf32, #tpu.memory_space<vmem>>, vector<8x128xf32>
    tpu.vector_store %arg5[%c0_18, %38], %19 {strides = array<i32>} : memref<8x128xf32, #tpu.memory_space<vmem>>, vector<8x128xf32>,
    %c0_i32_19 = arith.constant 0 : i32
    %40 = arith.cmpi eq, %arg1, %c0_i32_19 : i32
    %41 = arith.extui %40 : i1 to i32
    %c0_i32_20 = arith.constant 0 : i32
    %42 = arith.cmpi ne, %41, %c0_i32_20 : i32
    scf.if %42 {
      %c0_21 = arith.constant 0 : index
      %c0_22 = arith.constant 0 : index
      %43 = vector.load %arg6[%c0_21, %c0_22] : memref<8x1xf32, #tpu.memory_space<vmem>>, vector<8x1xf32>
      %c0_23 = arith.constant 0 : index
      %c0_24 = arith.constant 0 : index
      %44 = vector.load %arg7[%c0_23, %c0_24] : memref<8x1xf32, #tpu.memory_space<vmem>>, vector<8x1xf32>
      %45 = math.log %44 : vector<8x1xf32>
      %46 = arith.addf %43, %45 : vector<8x1xf32>
      %c0_25 = arith.constant 0 : index
      %c0_26 = arith.constant 0 : index
      %47 = vector.load %arg5[%c0_25, %c0_26] : memref<8x128xf32, #tpu.memory_space<vmem>>, vector<8x128xf32>
      %48 = vector.broadcast %46 : vector<8x1xf32> to vector<8x128xf32>
      %49 = arith.subf %47, %48 : vector<8x128xf32>
      %c0_27 = arith.constant 0 : index
      %c0_28 = arith.constant 0 : index
      %50 = vector.load %arg5[%c0_27, %c0_28] : memref<8x128xf32, #tpu.memory_space<vmem>>, vector<8x128xf32>
      tpu.vector_store %arg5[%c0_27, %c0_28], %49 {strides = array<i32>} : memref<8x128xf32, #tpu.memory_space<vmem>>, vector<8x128xf32>,
    } else {
    }
    return
  }
  func.func @transform_0(%arg0: i32, %arg1: i32) -> (i32, i32) {
    %c0_i32 = arith.constant 0 : i32
    %c0_i32_0 = arith.constant 0 : i32
    return %arg0, %c0_i32 : i32, i32
  }
  func.func @transform_1(%arg0: i32, %arg1: i32) -> (i32, i32) {
    %c0_i32 = arith.constant 0 : i32
    %c0_i32_0 = arith.constant 0 : i32
    return %arg1, %c0_i32 : i32, i32
  }
  func.func @transform_2(%arg0: i32, %arg1: i32) -> (i32, i32) {
    %c0_i32 = arith.constant 0 : i32
    %c0_i32_0 = arith.constant 0 : i32
    %c0_i32_1 = arith.constant 0 : i32
    return %c0_i32, %c0_i32_0 : i32, i32
  }
  func.func @transform_3(%arg0: i32, %arg1: i32) -> (i32, i32) {
    %c0_i32 = arith.constant 0 : i32
    %c0_i32_0 = arith.constant 0 : i32
    return %arg0, %c0_i32 : i32, i32
  }
}

</mosaic_0001>

<bundles_post_ra>
// kernel: tpu_custom_call.1
= control target key start
LH: loop header
LB: loop body
LE: loop exit
PB: predicated region body
PF: predicated region fallthrough
CT: control target
= control target key end

     0   :  { %vm50_vm0 = vcmask 261120   ;;  %v340_v1 = vmov 0.0   ;;  %vm341_vm1 = vmmov 0   ;;  %s461_s0 = inlined_call_operand.vmem [shape: f32[8,32], index: 0, kind: input, shape index: {}]   ;;  %s462_s1 = inlined_call_operand.vmem [shape: f32[128,32], index: 1, kind: input, shape index: {}]   ;;  %s463_s2 = inlined_call_operand.vmem [shape: f32[1,128], index: 2, kind: input, shape index: {}]   ;;  %s464_s3 = inlined_call_operand.hbm [shape: f32[8,128], index: 3, kind: output, shape index: {}]  }
   0x1   :  { %v38_v0 = vld [vmem:[%s462_s1 + $0x78] sm:$0xff]  ;;  %270 = vmatprep.subr.mxu0 %v340_v1  ;;  %302 = vmatprep.mubr.msk.f32.mxu0 %vm341_vm1, %v340_v1  ;;  %v37_v2 = vld [vmem:[%s462_s1 + $0x70] sm:$0xff] }
   0x2   :  { %271 = vmatpush3.xpose.msk.msra.mxu0 %vm50_vm0, %v38_v0 }
   0x3   :  { %272 = vmatprep.subr.mxu0 %v340_v1 }
   0x6   :  { %273 = vmatpush3.xpose.msk.msra.mxu0 %vm50_vm0, %v37_v2 }
   0x7   :  { %8 = vsyncpa [#allocation5], 0  ;;  %274 = vmatprep.subr.mxu0 %v340_v1  ;;  %v36_v3 = vld [vmem:[%s462_s1 + $0x68] sm:$0xff]  ;;  %v35_v4 = vld [vmem:[%s462_s1 + $0x60] sm:$0xff]  ;;  %v172_v18 = vlaneseq  ;;  %vm19_vm3 = vcmask 7168   ;;  %v342_v25 = vmov -inf  }
   0x8   :  { %v34_v5 = vld [vmem:[%s462_s1 + $0x58] sm:$0xff]  ;;  %v33_v6 = vld [vmem:[%s462_s1 + $0x50] sm:$0xff]  ;;  %v32_v7 = vld [vmem:[%s462_s1 + $0x48] sm:$0xff]  ;;  %20 = vst.msk [vmem:[#allocation2] sm:$0xff] %vm19_vm3, %v342_v25  ;;  %v343_v26 = vmov 0  }
   0x9   :  { %v31_v8 = vld [vmem:[%s462_s1 + $0x40] sm:$0xff]  ;;  %v30_v9 = vld [vmem:[%s462_s1 + $0x38] sm:$0xff]  ;;  %v29_v10 = vld [vmem:[%s462_s1 + $0x30] sm:$0xff]  ;;  %v173_v19 = vand.u32 127, %v172_v18  ;;  %21 = vst.msk [vmem:[#allocation3] sm:$0xff] %vm19_vm3, %v340_v1  ;;  %310 = vset.pattern.permute.xlu0 %v343_v26  ;;  %311 = vset.pattern.permute.xlu1 %v343_v26 }
   0xa   :  { %275 = vmatpush3.xpose.msk.msra.mxu0 %vm50_vm0, %v36_v3  ;;  %v28_v11 = vld [vmem:[%s462_s1 + $0x28] sm:$0xff]  ;;  %v27_v12 = vld [vmem:[%s462_s1 + $0x20] sm:$0xff]  ;;  %v26_v13 = vld [vmem:[%s462_s1 + $0x18] sm:$0xff] }
   0xb   :  { %276 = vmatprep.subr.mxu0 %v340_v1  ;;  %v25_v14 = vld [vmem:[%s462_s1 + $0x10] sm:$0xff]  ;;  %v24_v15 = vld [vmem:[%s462_s1 + $0x8] sm:$0xff]  ;;  %v23_v16 = vld [vmem:[%s462_s1] sm:$0xff]  ;;  %vm176_vm2 = vcmp.lt.s32.totalorder %v173_v19, 16 }
   0xc   :  { %v22_v17 = vld [vmem:[%s461_s0] sm:$0xff]  ;;  %s344_s0 = smov [#allocation4]  }
   0xd   :  { %v235_v20 = vld [vmem:[%s463_s2] ss:$0 sm:$0xff]  ;;  %s225_s1 = sshll.u32 %s344_s0, 4  ;;  %s226_s1 = int_to_ptr.vmem [resolvable:$true] %s225_s1 }
   0xe   :  { %277 = vmatpush3.xpose.msk.msra.mxu0 %vm50_vm0, %v35_v4  ;;  %s318_s2 = scalar_lea.vmem %s226_s1, 128  ;;  %p323_p1 = scmp.lt.s32.totalorder %s226_s1, %s226_s1 }
   0xf   :  { %278 = vmatprep.subr.mxu0 %v340_v1  ;;  %v178_v27 = vld [vmem:[#allocation2] sm:$0xff]  ;;  %p319_p0 = scmp.ne.s32.totalorder %s226_s1, %s318_s2  ;;  %p324_p2 = scmp.lt.s32.totalorder %s318_s2, %s318_s2 }
  0x10   :  { %v182_v37 = vld [vmem:[#allocation3] sm:$0xff] }
  0x11   :  { %p325_p3 = por %p324_p2, %p323_p1 }
  0x12   :  { %279 = vmatpush3.xpose.msk.msra.mxu0 %vm50_vm0, %v34_v5 }
  0x13   :  { %280 = vmatprep.subr.mxu0 %v340_v1  ;;  %p326_p4 = pnand %p325_p3, %p319_p0 }
  0x16   :  { %281 = vmatpush3.xpose.msk.msra.mxu0 %vm50_vm0, %v33_v6 }
  0x17   :  { %282 = vmatprep.subr.mxu0 %v340_v1 }
  0x1a   :  { %283 = vmatpush3.xpose.msk.msra.mxu0 %vm50_vm0, %v32_v7 }
  0x1b   :  { %284 = vmatprep.subr.mxu0 %v340_v1 }
  0x1e   :  { %285 = vmatpush3.xpose.msk.msra.mxu0 %vm50_vm0, %v31_v8 }
  0x1f   :  { %286 = vmatprep.subr.mxu0 %v340_v1 }
  0x22   :  { %287 = vmatpush3.xpose.msk.msra.mxu0 %vm50_vm0, %v30_v9 }
  0x23   :  { %288 = vmatprep.subr.mxu0 %v340_v1 }
  0x26   :  { %289 = vmatpush3.xpose.msk.msra.mxu0 %vm50_vm0, %v29_v10 }
  0x27   :  { %290 = vmatprep.subr.mxu0 %v340_v1 }
  0x2a   :  { %291 = vmatpush3.xpose.msk.msra.mxu0 %vm50_vm0, %v28_v11 }
  0x2b   :  { %292 = vmatprep.subr.mxu0 %v340_v1 }
  0x2e   :  { %293 = vmatpush3.xpose.msk.msra.mxu0 %vm50_vm0, %v27_v12 }
  0x2f   :  { %294 = vmatprep.subr.mxu0 %v340_v1 }
  0x32   :  { %295 = vmatpush3.xpose.msk.msra.mxu0 %vm50_vm0, %v26_v13 }
  0x33   :  { %296 = vmatprep.subr.mxu0 %v340_v1 }
  0x36   :  { %297 = vmatpush3.xpose.msk.msra.mxu0 %vm50_vm0, %v25_v14 }
  0x37   :  { %298 = vmatprep.subr.mxu0 %v340_v1 }
  0x3a   :  { %299 = vmatpush3.xpose.msk.msra.mxu0 %vm50_vm0, %v24_v15 }
  0x3b   :  { %300 = vmatprep.subr.mxu0 %v340_v1 }
  0x3e   :  { %301 = vmatpush3.xpose.msk.msra.mxu0 %vm50_vm0, %v23_v16 }
  0x41   :  { %303 = vmatmul.mubr.msk.f32.vlgmr.msra.gmra.mxu0 %vm50_vm0, %v22_v17 }
 0x101   :  { %v168_v21 = vpop.f32.mrf.mxu0 }
 0x102   :  { %v169_v22 = vadd.f32 %v235_v20, %v168_v21 }
 0x103   :  { %v304_v23 = vpop.f32.mrf.mxu0 }
 0x104   :  { %v177_v24 = vsel %vm176_vm2, %v169_v22, -1e+30 }
 0x105   :  { %179 = vmax.xlane.f32.xlu0 %v177_v24 }
 0x18e   :  { %v180_v28 = vpop.xlane.xlu0 %179 }
 0x18f   :  { %v181_v29 = vmax.f32 %v178_v27, %v180_v28 }
 0x191   :  { %v183_v30 = vsub.f32 %v178_v27, %v181_v29  ;;  %200 = vst.msk [vmem:[#allocation2] sm:$0xff] %vm19_vm3, %v181_v29  ;;  %189 = vperm.xlu0 %310, %v181_v29  }
 0x193   :  { %v184_v35 = vmul.f32 1.442695, %v183_v30 }
 0x198   :  { %v206_v44 = vld [vmem:[#allocation2] sm:$0xff] }
 0x20c   :  { %v190_v31 = vpop.permute.xlu0 %189 }
 0x20d   :  { %v192_v32 = vsub.f32 %v177_v24, %v190_v31 }
 0x20f   :  { %v193_v33 = vmul.f32 1.442695, %v192_v32 }
 0x211   :  { %312 = vpow2.f32 %v193_v33 }
 0x212   :  { %314 = vpow2.f32 %v184_v35 }
 0x21e   :  { %v313_v34 = vpop.eup %312 }
 0x21f   :  { %195 = vadd.xlane.f32.xlu1 %v313_v34  ;;  %v315_v36 = vpop.eup %314 }
 0x220   :  { %v186_v38 = vmul.f32 %v315_v36, %v182_v37 }
 0x2a8   :  { %v196_v39 = vpop.xlane.xlu1 %195 }
 0x2a9   :  { %v197_v40 = vadd.f32 %v196_v39, %v186_v38 }
 0x2ab   :  { %199 = vst.msk [vmem:[#allocation3] sm:$0xff] %vm19_vm3, %v197_v40 }
 0x2b2   :  { %v207_v41 = vld [vmem:[#allocation3] sm:$0xff] }
 0x2b3   :  { %316 = vlog2.f32 %v207_v41 }
 0x2c0   :  { %v317_v42 = vpop.eup %316 }
 0x2c1   :  { %v209_v43 = vmul.f32 0.6931472, %v317_v42 }
 0x2c3   :  { %v210_v45 = vadd.f32 %v209_v43, %v206_v44 }
 0x2c5   :  { %214 = vperm.xlu1 %311, %v210_v45  }
 0x340   :  { %v215_v46 = vpop.permute.xlu1 %214 }
 0x341   :  { %v217_v47 = vsub.f32 %v177_v24, %v215_v46 }
 0x343   :  { %218 = vst [vmem:[#allocation4] sm:$0xff] %v217_v47 }
 0x344   :  { %329 = shalt.err (!%p326_p4)
}
 0x345   :  { %228 = dma.vmem_to_hbm [thread:$0]  %s226_s1, 128, %s464_s3, [#allocation5]  }
 0x346   :  { %338 = dma.done.wait [#allocation5], 128  }
 0x347   :  { %339 = vsyncadd [#allocation5], 4294967168 }
 0x348   :  { %232 = vsyncpa [#allocation5], 1 }

</bundles_post_ra>
